<compile_context>
chip_gen: v7x
topology: tpu7x:2x2x1
jax: 0.10.0
libtpu: 0.0.40
codegen_flags: <defaults>
</compile_context>

<pallas_src>
import functools
from math import sqrt

import jax
import jax.numpy as jnp
from jax import lax
from jax.experimental import pallas as pl
from jax.experimental.pallas import tpu as pltpu


def _subpixel_conv_kernel(x_ref, w_ref, o_ref, *, W, C, scale, TG):
    """One (batch b, group-row tile t) grid step.

    x_ref: (1, Gp+1, W+2, C)        zero-padded low-res image, bf16 NHWC, resident across t
    w_ref: (4*C, scale^2*C)         folded sub-pixel weight, bf16
    o_ref: (1, TG*(W+1), scale^2*C) lane-dense group-planar output tile, f32

    Group (gy, gx), gy in [0, H], gx in [0, W], reads the 2x2 padded-low-res window
    rows {gy, gy+1} x cols {gx, gx+1} and produces the scale x scale block of high-res
    outputs at rows [(gy-1)*s+1, gy*s], cols [(gx-1)*s+1, gx*s] (pixel-shuffle + crop is
    done by the wrapper).
    """
    s = scale
    G1 = W + 1
    t = pl.program_id(1)

    start = t * TG
    if TG % 8 == 0:
        start = pl.multiple_of(start, 8)
    xs = x_ref[0, pl.ds(start, TG + 1), :, :]                 # (TG+1, W+2, C) bf16

    # 2x2 low-res patches: rows = (g, gx) row-major, cols = (by, bx, ci).
    c00 = xs[0:TG,     0:G1,    :].reshape(TG * G1, C)
    c01 = xs[0:TG,     1:W + 2, :].reshape(TG * G1, C)
    c10 = xs[1:TG + 1, 0:G1,    :].reshape(TG * G1, C)
    c11 = xs[1:TG + 1, 1:W + 2, :].reshape(TG * G1, C)
    p = jnp.concatenate([c00, c01, c10, c11], axis=-1)        # (M, 4C) bf16

    acc = jnp.dot(p, w_ref[...],
                  preferred_element_type=jnp.float32)         # (M, s^2*C) f32 on the MXU
    y = jnp.maximum(acc, 0.2 * acc)                           # LeakyReLU(0.2)

    o_ref[...] = y.reshape(1, TG * G1, s * s * C).astype(o_ref.dtype)


def _fold_weight(weight_hwio, scale):
    """Fold nearest-upsample(scale) + 3x3 SAME conv into a (4*Cin, scale^2*Cout) matrix.

    Wsub[(by*2+bx)*Cin + ci, (ry*s + rx)*Cout + co] =
        sum over (ky, kx) with (ry+ky)//s == by and (rx+kx)//s == bx of W[ky, kx, ci, co]
    """
    K, _, Cin, Cout = weight_hwio.shape
    s = scale
    w_sub = jnp.zeros((2, 2, Cin, s, s, Cout), dtype=jnp.float32)
    for ry in range(s):
        for rx in range(s):
            for ky in range(K):
                for kx in range(K):
                    by = (ry + ky) // s
                    bx = (rx + kx) // s
                    w_sub = w_sub.at[by, bx, :, ry, rx, :].add(
                        weight_hwio[ky, kx].astype(jnp.float32))
    return w_sub.reshape(4 * Cin, s * s * Cout)


def _pick_group_tile(G_rows, W, C, scale, n_batch, budget_bytes=24 << 20):
    """Group-rows per kernel step, from a VMEM budget.  Returns (TG, padded_G_rows)."""
    s = scale
    # rough per-group-row VMEM bytes: bf16 patch staging (x2), f32 matmul result (x2),
    # double-buffered f32 output block, plus the xs row itself.
    per_g = (W + 1) * (16 * C + 16 * s * s * C) + (W + 2) * C * 2
    tg = max(1, min(G_rows, budget_bytes // max(per_g, 1)))
    if n_batch == 1 and G_rows >= 16:
        tg = min(tg, (G_rows + 1) // 2)      # >= 2 parallel tiles for the 2nd v7x core
    if tg < G_rows:
        tg = max(8, (tg // 8) * 8)           # out block's sublane dim must be 8-aligned
    if tg >= G_rows:
        return G_rows, G_rows                # single tile, no padding needed
    g_pad = ((G_rows + tg - 1) // tg) * tg   # ragged tail handled by zero-padding rows
    return tg, g_pad


def upscale_block(x_nchw, weight_hwio, scale):
    """Forward pass of UpscaleBlock.

    x_nchw:      (N, C, H, W)  float32
    weight_hwio: (3, 3, C, C)  float32  (torch (O,I,kH,kW) transposed to (kH,kW,I,O))
    returns:     (N, C, H*scale, W*scale) float32
    """
    N, C, H, W = x_nchw.shape
    K = weight_hwio.shape[0]
    s = int(scale)
    # Sub-pixel folding needs every high-res pixel to see at most a 2x2 low-res window:
    # true for K == 3, pad == 1, scale >= 2 (the RealESRGAN configuration).
    assert K == 3 and s >= 2, "sub-pixel kernel assumes f=3 and scale>=2"
    # TODO(synk): K > scale + 1 (e.g. scale=1) needs a wider low-res window / plain conv path.
    Hs, Ws = H * s, W * s
    G_rows, G_cols = H + 1, W + 1

    TG, G_pad = _pick_group_tile(G_rows, W, C, s, N)
    n_tiles = G_pad // TG

    # NHWC, bf16, zero halo of 1 at LOW resolution; extra zero rows at the bottom when the
    # group-row count is padded up to a multiple of TG (their outputs are cropped away).
    x = jnp.transpose(x_nchw, (0, 2, 3, 1)).astype(jnp.bfloat16)
    xpad = jnp.pad(x, ((0, 0), (1, 1 + (G_pad - G_rows)), (1, 1), (0, 0)))

    w_sub = _fold_weight(weight_hwio, s).astype(jnp.bfloat16)        # (4C, s^2*C)

    kernel = functools.partial(_subpixel_conv_kernel, W=W, C=C, scale=s, TG=TG)

    out_cols = s * s * C
    flops = 2 * N * G_pad * G_cols * (4 * C) * out_cols
    bytes_accessed = int(xpad.size) * 2 + int(w_sub.size) * 2 \
        + N * G_pad * G_cols * out_cols * 4

    resident = 2 * (G_pad + 1) * (W + 2) * C * 2 + 2 * int(w_sub.size) * 2
    per_tile = TG * ((W + 1) * (16 * C + 16 * s * s * C) + (W + 2) * C * 2)
    vmem_limit = int(min(48 << 20, max(32 << 20, 2 * (resident + per_tile))))

    out = pl.pallas_call(
        kernel,
        out_shape=jax.ShapeDtypeStruct((N, G_pad * G_cols, out_cols), jnp.float32),
        grid_spec=pltpu.PrefetchScalarGridSpec(
            num_scalar_prefetch=0,
            grid=(N, n_tiles),
            in_specs=[
                # whole (small) padded low-res image; block index depends only on b, so it
                # stays resident in VMEM across the group-row-tile axis.
                pl.BlockSpec((1, G_pad + 1, W + 2, C), lambda b, t: (b, 0, 0, 0)),
                pl.BlockSpec((4 * C, out_cols), lambda b, t: (0, 0)),
            ],
            out_specs=pl.BlockSpec((1, TG * G_cols, out_cols), lambda b, t: (b, t, 0)),
        ),
        compiler_params=pltpu.CompilerParams(
            dimension_semantics=("parallel", "parallel"),
            vmem_limit_bytes=vmem_limit),
        cost_estimate=pl.CostEstimate(flops=flops, transcendentals=0,
                                      bytes_accessed=bytes_accessed),
    )(xpad, w_sub)

    # Pixel shuffle (group-planar -> spatial), border crop, NCHW: one XLA relayout pass over
    # the output (rev 2 already paid an NCHW transpose here).
    out = out.reshape(N, G_pad, G_cols, s, s, C)
    out = jnp.transpose(out, (0, 1, 3, 2, 4, 5)).reshape(N, G_pad * s, G_cols * s, C)
    out = out[:, s - 1:s - 1 + Hs, s - 1:s - 1 + Ws, :]
    return jnp.transpose(out, (0, 3, 1, 2))


def _reference(x_nchw, weight_hwio, scale, dtype=jnp.float32):
    """Pure-JAX reference matching the PyTorch module (optionally with bf16 inputs)."""
    x = jnp.transpose(x_nchw, (0, 2, 3, 1)).astype(dtype)
    x = jnp.repeat(jnp.repeat(x, scale, axis=1), scale, axis=2)   # nearest upsample
    y = lax.conv_general_dilated(
        x, weight_hwio.astype(dtype), window_strides=(1, 1), padding="SAME",
        dimension_numbers=("NHWC", "HWIO", "NHWC"),
        preferred_element_type=jnp.float32)
    y = jnp.where(y > 0, y, 0.2 * y)
    return jnp.transpose(y, (0, 3, 1, 2)).astype(jnp.float32)


if __name__ == "__main__":
    # Small instantiation: UpscaleBlock(scale=2, f=3, n=32), input NCHW (2, 32, 8, 8).
    scale, f, n = 2, 3, 32
    N, H, W = 2, 8, 8

    key = jax.random.PRNGKey(0)
    kx, kw = jax.random.split(key)
    x = jax.random.normal(kx, (N, n, H, W), dtype=jnp.float32)
    # Deterministic Kaiming-like init for the conv weight, HWIO layout.
    weight = jax.random.normal(kw, (f, f, n, n), dtype=jnp.float32) * sqrt(2.0 / (f * f * n))

    out = jax.block_until_ready(upscale_block(x, weight, scale))
    assert out.shape == (N, n, H * scale, W * scale), out.shape

    # Check against a reference with the same bf16-input / f32-accum policy.
    ref_bf16 = jax.block_until_ready(_reference(x, weight, scale, dtype=jnp.bfloat16))
    err_b = float(jnp.max(jnp.abs(out - ref_bf16)))
    assert jnp.allclose(out, ref_bf16, atol=5e-2, rtol=5e-2), err_b

    # Loose check against exact f32 module semantics (bf16 quantization noise only).
    ref_f32 = jax.block_until_ready(_reference(x, weight, scale, dtype=jnp.float32))
    err_f = float(jnp.max(jnp.abs(out - ref_f32)))
    assert jnp.allclose(out, ref_f32, atol=1e-1, rtol=1e-1), err_f

    print("KERNEL_OK")
</pallas_src>

<mosaic_0001>
module attributes {stable_mosaic.version = 11 : i64} {
  func.func @_subpixel_conv_kernel(%arg0: i32, %arg1: i32, %arg2: memref<1x10x10x32xbf16, #tpu.memory_space<vmem>>, %arg3: memref<128x128xbf16, #tpu.memory_space<vmem>>, %arg4: memref<1x81x128xf32, #tpu.memory_space<vmem>>) attributes {dimension_semantics = [#tpu.dimension_semantics<parallel>, #tpu.dimension_semantics<parallel>], iteration_bounds = array<i64: 2, 1>, scalar_prefetch = 0 : i64, scratch_operands = 0 : i64, tpu.core_type = #tpu.core_type<tc>, window_params = [{transform_indices = @transform_0, window_bounds = array<i64: 1, 10, 10, 32>}, {pipeline_mode = #tpu.pipeline_mode<synchronous>, transform_indices = @transform_1, window_bounds = array<i64: 128, 128>}, {transform_indices = @transform_2, window_bounds = array<i64: 1, 81, 128>}]} {
    %c9_i32 = arith.constant 9 : i32
    %0 = arith.muli %arg1, %c9_i32 : i32
    %c0 = arith.constant 0 : index
    %1 = arith.index_cast %0 : i32 to index
    %c0_0 = arith.constant 0 : index
    %c0_1 = arith.constant 0 : index
    %2 = vector.load %arg2[%c0, %1, %c0_0, %c0_1] : memref<1x10x10x32xbf16, #tpu.memory_space<vmem>>, vector<1x10x10x32xbf16>
    %3 = vector.shape_cast %2 : vector<1x10x10x32xbf16> to vector<10x10x32xbf16>
    %4 = vector.extract_strided_slice %3 {offsets = [0, 0, 0], sizes = [9, 9, 32], strides = [1, 1, 1]} : vector<10x10x32xbf16> to vector<9x9x32xbf16>
    %5 = vector.shape_cast %4 : vector<9x9x32xbf16> to vector<81x32xbf16>
    %6 = vector.extract_strided_slice %3 {offsets = [0, 1, 0], sizes = [9, 9, 32], strides = [1, 1, 1]} : vector<10x10x32xbf16> to vector<9x9x32xbf16>
    %7 = vector.shape_cast %6 : vector<9x9x32xbf16> to vector<81x32xbf16>
    %8 = vector.extract_strided_slice %3 {offsets = [1, 0, 0], sizes = [9, 9, 32], strides = [1, 1, 1]} : vector<10x10x32xbf16> to vector<9x9x32xbf16>
    %9 = vector.shape_cast %8 : vector<9x9x32xbf16> to vector<81x32xbf16>
    %10 = vector.extract_strided_slice %3 {offsets = [1, 1, 0], sizes = [9, 9, 32], strides = [1, 1, 1]} : vector<10x10x32xbf16> to vector<9x9x32xbf16>
    %11 = vector.shape_cast %10 : vector<9x9x32xbf16> to vector<81x32xbf16>
    %12 = tpu.concatenate %5, %7, %9, %11 in 1 : vector<81x32xbf16>, vector<81x32xbf16>, vector<81x32xbf16>, vector<81x32xbf16> -> vector<81x128xbf16>
    %c0_2 = arith.constant 0 : index
    %c0_3 = arith.constant 0 : index
    %13 = vector.load %arg3[%c0_2, %c0_3] : memref<128x128xbf16, #tpu.memory_space<vmem>>, vector<128x128xbf16>
    %cst = arith.constant dense<0.000000e+00> : vector<81x128xf32>
    %14 = tpu.matmul %12, %13, %cst {dimension_numbers = #tpu.dot_dimension_numbers<[1], [0], [0], [1], [0, 0, 1, 1], [], []>} : vector<81x128xbf16>, vector<128x128xbf16>, vector<81x128xf32> -> vector<81x128xf32>
    %cst_4 = arith.constant 2.000000e-01 : f32
    %15 = vector.broadcast %cst_4 : f32 to vector<81x128xf32>
    %16 = arith.mulf %15, %14 : vector<81x128xf32>
    %17 = arith.maximumf %14, %16 : vector<81x128xf32>
    %18 = vector.shape_cast %17 : vector<81x128xf32> to vector<1x81x128xf32>
    %c0_5 = arith.constant 0 : index
    %c0_6 = arith.constant 0 : index
    %c0_7 = arith.constant 0 : index
    %19 = vector.load %arg4[%c0_5, %c0_6, %c0_7] : memref<1x81x128xf32, #tpu.memory_space<vmem>>, vector<1x81x128xf32>
    tpu.vector_store %arg4[%c0_5, %c0_6, %c0_7], %18 {strides = array<i32>} : memref<1x81x128xf32, #tpu.memory_space<vmem>>, vector<1x81x128xf32>,
    return
  }
  func.func @transform_0(%arg0: i32, %arg1: i32) -> (i32, i32, i32, i32) {
    %c0_i32 = arith.constant 0 : i32
    %c0_i32_0 = arith.constant 0 : i32
    %c0_i32_1 = arith.constant 0 : i32
    %c0_i32_2 = arith.constant 0 : i32
    return %arg0, %c0_i32, %c0_i32_0, %c0_i32_1 : i32, i32, i32, i32
  }
  func.func @transform_1(%arg0: i32, %arg1: i32) -> (i32, i32) {
    %c0_i32 = arith.constant 0 : i32
    %c0_i32_0 = arith.constant 0 : i32
    %c0_i32_1 = arith.constant 0 : i32
    return %c0_i32, %c0_i32_0 : i32, i32
  }
  func.func @transform_2(%arg0: i32, %arg1: i32) -> (i32, i32, i32) {
    %c0_i32 = arith.constant 0 : i32
    %c0_i32_0 = arith.constant 0 : i32
    return %arg0, %arg1, %c0_i32 : i32, i32, i32
  }
}

</mosaic_0001>

<bundles_post_ra>
// kernel: tpu_custom_call.1
= control target key start
LH: loop header
LB: loop body
LE: loop exit
PB: predicated region body
PF: predicated region fallthrough
CT: control target
= control target key end

     0   :  { %s2327_s9 = smov 0   ;;  %s2329_s10 = smov 0   ;;  %s2980_s0 = inlined_call_operand.vmem [shape: bf16[2,10,10,32], index: 0, kind: input, shape index: {}]   ;;  %s2981_s1 = inlined_call_operand.vmem [shape: bf16[128,128], index: 1, kind: input, shape index: {}]   ;;  %s2982_s2 = inlined_call_operand.vmem [shape: f32[2,81,128], index: 2, kind: output, shape index: {}]  }
   0x1   :  { %s2331_s11 = smov 0  }
   0x2 LB: > { %s24_s12 = sadd.s32 1, %s2302_s10  ;;  %p2099_p0 = scmp.ge.s32.totalorder %s2306_s11, 1  ;;  %s2306_s11 = sphi %s2331_s11, %s12_s11   ;;  %s2302_s10 = sphi %s2329_s10, %s3021_s10   ;;  %s2298_s9 = sphi %s2327_s9, %s3020_s9  }
   0x3   : > { %p26_p1 = scmp.ge.s32.totalorder %s24_s12, 2  ;;  %p126_p2 = scmp.lt.s32.totalorder %s2306_s11, 3 }
   0x5   : > { %s3023_s12 = smov (%p26_p1, %s24_s12), 0  ;;  %p127_p3 = pnand %p2099_p0, %p126_p2 }
   0x7   : > { %130 = sbr.rel (%p127_p3) target bundleno = 455 (0x1c7), region = 28 }
   0xe   : > { %p152_p4 = scmp.lt.s32.totalorder %s2298_s9, 1  ;;  %v221_v0 = vlaneseq  ;;  %v2308_v1 = vmov 1966171168   ;;  %v2276_v3 = vld [vmem:[%s2981_s1] sm:$0xff]   ;;  %v2277_v4 = vld [vmem:[%s2981_s1 + $0x8] sm:$0xff]   ;;  %v2278_v7 = vld [vmem:[%s2981_s1 + $0x10] sm:$0xff]  }
   0xf   : > { %v219_v2 = vunpack.c.l.s4 %v2308_v1  ;;  %2230 = vmatprep.subr.bf16.mxu1 %v2276_v3  ;;  %2202 = vmatprep.subr.bf16.mxu0 %v2276_v3  ;;  %v2279_v10 = vld [vmem:[%s2981_s1 + $0x18] sm:$0xff]   ;;  %v2280_v32 = vld [vmem:[%s2981_s1 + $0x20] sm:$0xff]   ;;  %s2309_s27 = smov 32   ;;  %s2310_s28 = smov 64   ;;  %vm1784_vm0 = vcmask 261120   ;;  %vm1803_vm1 = vcmask 523264  }
  0x10   : > { %s3025_s9 = smov (!%p152_p4, %s2298_s9), 1  ;;  %v222_v5 = vshrl.u32 %v221_v0, 7  ;;  %2238 = vmatpush3.bf16.msra.mxu1 %v2276_v3  ;;  %2203 = vmatpush3.bf16.msra.mxu0 %v2276_v3  ;;  %s2311_s7 = smov 96   ;;  %vm1816_vm2 = vcmask 785408  }
  0x11   : > { %v220_v6 = vunpack.c.0.s8 %v219_v2  ;;  %s2246_s17 = smul.u32 80, %s3025_s9  ;;  %2231 = vmatprep.subr.bf16.mxu1 %v2277_v4  ;;  %2204 = vmatprep.subr.bf16.mxu0 %v2277_v4 }
  0x12   : > { %s2247_s8 = smul.u32 88, %s3025_s9 }
  0x13   : > { %s2360_s22 = scalar_lea.vmem %s2980_s0, %s2246_s17  ;;  %v2362_v8 = vsub.s32 %v220_v6, %v222_v5 }
  0x14   : > { %v2119_v9 = vld.sshfl [vmem:[%s2360_s22 + $0x44] sm:$0x1 pattern:$0x75316420]  ;;  %2239 = vmatpush3.bf16.msra.mxu1 %v2277_v4  ;;  %2205 = vmatpush3.bf16.msra.mxu0 %v2277_v4  ;;  %s2958_s15 = scalar_lea.vmem %s2982_s2, %s2247_s8 }
  0x15   : > { %v2369_v11 = vrot.slane %v2119_v9, %v2362_v8  ;;  %v2121_v12 = vld.sshfl [vmem:[%s2360_s22 + $0x4c] sm:$0x1 pattern:$0x75316420]  ;;  %2232 = vmatprep.subr.bf16.mxu1 %v2278_v7  ;;  %2206 = vmatprep.subr.bf16.mxu0 %v2278_v7 }
  0x16   : > { %v2373_v13 = vrot.slane %v2121_v12, %v2362_v8  ;;  %v2104_v14 = vld.sshfl [vmem:[%s2360_s22 + $0x8] sm:$0x33 pattern:$0x75316420] }
  0x17   : > { %v641_v15 = vunpack.i.h.s16 %v2369_v11  ;;  %v2105_v16 = vld.sshfl [vmem:[%s2360_s22 + $0xc] sm:$0x1 pattern:$0x75316420]  ;;  %v255_v17 = vcombine.high %v2104_v14, %v2104_v14  ;;  %v2381_v20 = vrot.slane %v2104_v14, %v2362_v8 }
  0x18   : > { %v690_v18 = vunpack.i.l.s16 %v2373_v13  ;;  %v2106_v19 = vld.sshfl [vmem:[%s2360_s22 + $0x10] sm:$0x33 pattern:$0x75316420]  ;;  %v2384_v21 = vrot.slane %v2105_v16, %v2362_v8  ;;  %2240 = vmatpush3.bf16.msra.mxu1 %v2278_v7  ;;  %2207 = vmatpush3.bf16.msra.mxu0 %v2278_v7 }
  0x19   : > { %v1284_v23 = vrot.slane %v641_v15, %v2362_v8  ;;  %v2389_v24 = vrot.slane %v255_v17, %v2362_v8  ;;  %v293_v25 = vcombine.high %v2106_v19, %v2106_v19  ;;  %v2392_v26 = vrot.slane %v2106_v19, %v2362_v8  ;;  %v2110_v27 = vld.sshfl [vmem:[%s2360_s22 + $0x20] sm:$0x33 pattern:$0x75316420]  ;;  %2233 = vmatprep.subr.bf16.mxu1 %v2279_v10 }
  0x1a   : > { %v1480_v28 = vrot.slane %v690_v18, %v2362_v8  ;;  %v369_v29 = vcombine.high %v2110_v27, %v2110_v27  ;;  %v2397_v30 = vrot.slane %v2110_v27, %v2362_v8  ;;  %v2111_v37 = vld.sshfl [vmem:[%s2360_s22 + $0x24] sm:$0x1 pattern:$0x75316420]  ;;  %2208 = vmatprep.subr.bf16.mxu0 %v2279_v10  ;;  %v2281_v18 = vld [vmem:[%s2981_s1 + $0x28] sm:$0xff]  }
  0x1b   : > { %v1291_v33 = vrot.slane %v1284_v23, %v2362_v8  ;;  %v2405_v34 = vrot.slane %v293_v25, %v2362_v8  ;;  %v2409_v35 = vcombine.high %v2392_v26, %v2392_v26  ;;  %v2984_v36 = vunpack.i.h.s16 %v2392_v26  ;;  %v2112_v42 = vld.sshfl [vmem:[%s2360_s22 + $0x28] sm:$0x33 pattern:$0x75316420] }
  0x1c   : > { %v1487_v38 = vrot.slane %v1480_v28, %v2362_v8  ;;  %v2165_v39 = vcombine.high %v2381_v20, %v2389_v24  ;;  %v2167_v40 = vpack.i.b16 %v2392_v26, %v2384_v21  ;;  %v1317_v41 = vcombine.low %v2381_v20, %v2389_v24  ;;  %v2113_v47 = vld.sshfl [vmem:[%s2360_s22 + $0x2c] sm:$0x1 pattern:$0x75316420]  ;;  %2241 = vmatpush3.bf16.msra.mxu1 %v2279_v10 }
  0x1d   : > { %2998 = vst [vmem:[#allocation2_spill] sm:$0xff] %v2409_v35  ;;  %1302 = vrot.lane.b32.xlu1 %v1291_v33, %s2309_s27  ;;  %v2424_v43 = vcombine.high %v2405_v34, %v2405_v34  ;;  %v573_v44 = vunpack.i.h.s16 %v2405_v34  ;;  %v575_v45 = vunpack.i.h.s16 %v2409_v35  ;;  %v2431_v46 = vpack.i.b16 %v2405_v34, %v2984_v36  ;;  %v2114_v50 = vld.sshfl [vmem:[%s2360_s22 + $0x30] sm:$0x33 pattern:$0x75316420]  ;;  %2234 = vmatprep.subr.bf16.mxu1 %v2280_v32 }
  0x1e   : > { %v2435_v48 = vrot.slane %v2165_v39, %v2362_v8  ;;  %v1325_v49 = vrot.slane %v1317_v41, %v2362_v8  ;;  %v2440_v51 = vrot.slane %v369_v29, %v2362_v8  ;;  %v2444_v52 = vcombine.high %v2397_v30, %v2397_v30  ;;  %2209 = vmatpush3.bf16.msra.mxu0 %v2279_v10  ;;  %v2461_v61 = vld.sshfl [vmem:[%s2360_s22 + $0x18] sm:$0x33 pattern:$0x75316420] }
  0x1f   : > { %2999 = vst [vmem:[#allocation3_spill] sm:$0xff] %v2424_v43  ;;  %v2150_v53 = vpack.i.b16 %v2409_v35, %v573_v44  ;;  %v2151_v54 = vpack.i.b16 %v2424_v43, %v575_v45  ;;  %v1318_v55 = vcombine.low %v2167_v40, %v2431_v46  ;;  %v2450_v56 = vrot.slane %v2111_v37, %v2362_v8  ;;  %v2109_v10 = vld.sshfl [vmem:[%s2360_s22 + $0x1c] sm:$0x1 pattern:$0x75316420] }
  0x20   : > { %v1333_v57 = vcombine.low %v1325_v49, %v2435_v48  ;;  %v2455_v58 = vcombine.high %v2440_v51, %v2440_v51  ;;  %v407_v59 = vcombine.high %v2112_v42, %v2112_v42  ;;  %v2458_v60 = vrot.slane %v2112_v42, %v2362_v8  ;;  %2210 = vmatprep.subr.bf16.mxu0 %v2280_v32 }
  0x21   : > { %1498 = vrot.lane.b32.xlu1 %v1487_v38, %s2310_s28  ;;  %v1083_v62 = vcombine.low %v2150_v53, %v2151_v54  ;;  %v1332_v63 = vrot.slane %v1318_v55, %v2362_v8  ;;  %v2466_v0 = vrot.slane %v2113_v47, %v2362_v8  ;;  %v445_v1 = vcombine.high %v2114_v50, %v2114_v50  ;;  %v2115_v47 = vld.sshfl [vmem:[%s2360_s22 + $0x34] sm:$0x1 pattern:$0x75316420] }
  0x22   : > { %v1341_v2 = vrot.slane %v1333_v57, %v2362_v8  ;;  %v2470_v3 = vrot.slane %v407_v59, %v2362_v8  ;;  %v2473_v4 = vrot.slane %v2114_v50, %v2362_v8  ;;  %v593_v5 = vunpack.i.h.s16 %v2444_v52  ;;  %2242 = vmatpush3.bf16.msra.mxu1 %v2280_v32  ;;  %2211 = vmatpush3.bf16.msra.mxu0 %v2280_v32  ;;  %v2116_v55 = vld.sshfl [vmem:[%s2360_s22 + $0x38] sm:$0x33 pattern:$0x75316420] }
  0x23   : > { %v2477_v6 = vrot.slane %v1083_v62, %v2362_v8  ;;  %v2480_v7 = vrot.slane %v445_v1, %v2362_v8  ;;  %v595_v9 = vunpack.i.h.s16 %v2455_v58  ;;  %v331_v12 = vcombine.high %v2461_v61, %v2461_v61  ;;  %2235 = vmatprep.subr.bf16.mxu1 %v2281_v18  ;;  %2212 = vmatprep.subr.bf16.mxu0 %v2281_v18 }
  0x24   : > { %v2986_v14 = vunpack.i.h.s16 %v2473_v4  ;;  %v2155_v15 = vpack.i.b16 %v2455_v58, %v593_v5  ;;  %v2166_v16 = vcombine.high %v2458_v60, %v2470_v3  ;;  %v2169_v17 = vpack.i.b16 %v2473_v4, %v2466_v0 }
  0x25   : > { %v1334_v19 = vcombine.low %v1332_v63, %v2477_v6  ;;  %v2156_v23 = vpack.i.b16 %v2450_v56, %v595_v9  ;;  %v1383_v25 = vcombine.low %v2458_v60, %v2470_v3  ;;  %v2500_v27 = vrot.slane %v331_v12, %v2362_v8  ;;  %v2117_v63 = vld.sshfl [vmem:[%s2360_s22 + $0x3c] sm:$0x1 pattern:$0x75316420] }
  0x26   : > { %v2505_v28 = vpack.i.b16 %v2480_v7, %v2986_v14  ;;  %v2508_v29 = vrot.slane %v2166_v16, %v2362_v8  ;;  %v2511_v32 = vrot.slane %v2109_v10, %v2362_v8  ;;  %v2983_v33 = vunpack.i.h.s16 %v2397_v30  ;;  %2243 = vmatpush3.bf16.msra.mxu1 %v2281_v18  ;;  %2213 = vmatpush3.bf16.msra.mxu0 %v2281_v18 }
  0x27   : > { %v1348_v37 = vrot.slane %v1334_v19, %v2362_v8  ;;  %v1133_v38 = vcombine.low %v2155_v15, %v2156_v23  ;;  %v1391_v39 = vrot.slane %v1383_v25, %v2362_v8  ;;  %v2518_v40 = vcombine.high %v2500_v27, %v2500_v27 }
  0x28   : > { %v1384_v41 = vcombine.low %v2169_v17, %v2505_v28  ;;  %v591_v42 = vunpack.i.h.s16 %v2440_v51  ;;  %v598_v44 = vunpack.i.h.s16 %v2458_v60  ;;  %v637_v45 = vunpack.i.h.s16 %v2450_v56  ;;  %v2118_v17 = vld.sshfl [vmem:[%s2360_s22 + $0x40] sm:$0x33 pattern:$0x75316420] }
  0x29   : > { %v1349_v49 = vcombine.low %v1341_v2, %v1348_v37  ;;  %v1155_v50 = vrot.slane %v1133_v38, %v2362_v8  ;;  %v2153_v53 = vpack.i.b16 %v2440_v51, %v2983_v33  ;;  %v1131_v54 = vcombine.low %v2518_v40, %v2511_v32 }
  0x2a   : > { %v1398_v57 = vrot.slane %v1384_v41, %v2362_v8  ;;  %v2154_v59 = vpack.i.b16 %v2444_v52, %v591_v42  ;;  %v1014_v62 = vpack.i.b16 %v598_v44, %v637_v45  ;;  %v2539_v1 = vcombine.high %v2473_v4, %v2473_v4 }
  0x2b   : > { %1488 = vrot.lane.b32.xlu0 %v1349_v49, %s2310_s28  ;;  %v1399_v2 = vcombine.low %v1155_v50, %v1391_v39  ;;  %v1141_v5 = vrot.slane %v1131_v54, %v2362_v8  ;;  %v2545_v9 = vcombine.high %v2480_v7, %v2480_v7  ;;  %v2548_v10 = vrot.slane %v2115_v47, %v2362_v8 }
  0x2c   : > { %v1400_v12 = vcombine.low %v2508_v29, %v1398_v57  ;;  %v1132_v15 = vcombine.low %v2153_v53, %v2154_v59  ;;  %v1134_v16 = vcombine.low %v1014_v62, %v2470_v3  ;;  %v483_v18 = vcombine.high %v2116_v55, %v2116_v55 }
  0x2d   : > { %v1407_v19 = vrot.slane %v1399_v2, %v2362_v8  ;;  %v2555_v23 = vrot.slane %v2116_v55, %v2362_v8  ;;  %v2558_v25 = vrot.slane %v2117_v63, %v2362_v8  ;;  %v521_v37 = vcombine.high %v2118_v17, %v2118_v17 }
  0x2e   : > { %v1414_v38 = vrot.slane %v1400_v12, %v2362_v8  ;;  %v2562_v39 = vrot.slane %v1132_v15, %v2362_v8  ;;  %v1162_v41 = vrot.slane %v1134_v16, %v2362_v8  ;;  %v497_v42 = vrot.slane %v483_v18, %v2362_v8  ;;  %v2282_v15 = vld [vmem:[%s2981_s1 + $0x30] sm:$0xff]  }
  0x2f   : > { %v498_v45 = vcombine.high %v2555_v23, %v2555_v23  ;;  %v2569_v47 = vrot.slane %v2118_v17, %v2362_v8  ;;  %v2572_v49 = vrot.slane %v521_v37, %v2362_v8  ;;  %v609_v53 = vunpack.i.h.s16 %v2480_v7  ;;  %2236 = vmatprep.subr.bf16.mxu1 %v2282_v15  ;;  %2214 = vmatprep.subr.bf16.mxu0 %v2282_v15 }
  0x30   : > { %v1415_v54 = vcombine.low %v1407_v19, %v1414_v38  ;;  %v1163_v55 = vcombine.low %v1141_v5, %v2562_v39  ;;  %v1164_v57 = vcombine.low %v1155_v50, %v1162_v41  ;;  %v2576_v59 = vcombine.high %v497_v42, %v497_v42  ;;  %2244 = vmatpush3.bf16.msra.mxu1 %v2282_v15 }
  0x31   : > { %3000 = vst [vmem:[#allocation4_spill] sm:$0xff] %v2569_v47  ;;  %v611_v62 = vunpack.i.h.s16 %v2539_v1  ;;  %v613_v63 = vunpack.i.h.s16 %v2545_v9  ;;  %v2158_v2 = vpack.i.b16 %v2539_v1, %v609_v53  ;;  %v1229_v12 = vcombine.low %v497_v42, %v498_v45  ;;  %2215 = vmatpush3.bf16.msra.mxu0 %v2282_v15 }
  0x32   : > { %1492 = vrot.lane.b32.xlu1 %v1415_v54, %s2310_s28  ;;  %v1171_v16 = vrot.slane %v1163_v55, %v2362_v8  ;;  %v1178_v5 = vrot.slane %v1164_v57, %v2362_v8  ;;  %v2170_v50 = vpack.i.b16 %v2569_v47, %v2558_v25  ;;  %v616_v17 = vunpack.i.h.s16 %v2555_v23 }
  0x33   : > { %v2159_v18 = vpack.i.b16 %v2545_v9, %v611_v62  ;;  %v2160_v19 = vpack.i.b16 %v2548_v10, %v613_v63  ;;  %v2593_v37 = vrot.slane %v1229_v12, %v2362_v8  ;;  %v639_v38 = vunpack.i.h.s16 %v2548_v10 }
  0x34   : > { %v1179_v41 = vcombine.low %v1171_v16, %v1178_v5  ;;  %v1417_v53 = vcombine.low %v2576_v59, %v2170_v50  ;;  %v1181_v54 = vcombine.low %v2466_v0, %v2505_v28  ;;  %v618_v55 = vunpack.i.h.s16 %v497_v42 }
  0x35   : > { %v1182_v57 = vcombine.low %v2158_v2, %v2159_v18  ;;  %v1416_v62 = vcombine.low %v2160_v19, %v2555_v23  ;;  %v1023_v63 = vpack.i.b16 %v616_v17, %v639_v38  ;;  %v620_v33 = vunpack.i.h.s16 %v498_v45 }
  0x36   : > { %1296 = vrot.lane.b32.xlu0 %v1179_v41, %s2309_s27  ;;  %v1431_v12 = vrot.slane %v1417_v53, %v2362_v8  ;;  %v1197_v36 = vrot.slane %v1181_v54, %v2362_v8  ;;  %v622_v16 = vunpack.i.h.s16 %v2576_v59  ;;  %v2985_v5 = vunpack.i.h.s16 %v2569_v47  ;;  %v2283_v54 = vld [vmem:[%s2981_s1 + $0x38] sm:$0xff]  }
  0x37   : > { %v1204_v28 = vrot.slane %v1182_v57, %v2362_v8  ;;  %v1424_v50 = vrot.slane %v1416_v62, %v2362_v8  ;;  %v1183_v15 = vcombine.low %v2160_v19, %v1023_v63  ;;  %v640_v2 = vunpack.i.h.s16 %v2558_v25  ;;  %2237 = vmatprep.subr.bf16.mxu1 %v2283_v54  ;;  %2216 = vmatprep.subr.bf16.mxu0 %v2283_v54 }
  0x38   : > { %v1433_v18 = vcombine.low %v2593_v37, %v1431_v12  ;;  %v1212_v38 = vcombine.low %v2508_v29, %v1197_v36  ;;  %v2610_v41 = vpack.i.b16 %v497_v42, %v616_v17  ;;  %v2612_v53 = vpack.i.b16 %v498_v45, %v618_v55  ;;  %2245 = vmatpush3.bf16.msra.mxu1 %v2283_v54 }
  0x39   : > { %v1432_v22 = vcombine.low %v1204_v28, %v1424_v50  ;;  %v1211_v57 = vrot.slane %v1183_v15, %v2362_v8  ;;  %v2619_v62 = vpack.i.b16 %v2576_v59, %v620_v33  ;;  %v2622_v19 = vpack.i.b16 %v2558_v25, %v622_v16  ;;  %2217 = vmatpush3.bf16.msra.mxu0 %v2283_v54 }
  0x3a   : > { %v1447_v63 = vrot.slane %v1433_v18, %v2362_v8  ;;  %v1220_v36 = vrot.slane %v1212_v38, %v2362_v8  ;;  %v1506_v29 = vpack.i.b16 %v2985_v5, %v640_v2  ;;  %v2177_v42 = vcombine.high %v2473_v4, %v2480_v7 }
  0x3b   : > { %3001 = vst [vmem:[#allocation5_spill] sm:$0xff] %v2619_v62  ;;  %v1440_v45 = vrot.slane %v1432_v22, %v2362_v8  ;;  %v1213_v17 = vcombine.low %v1204_v28, %v1211_v57  ;;  %v1661_v33 = vcombine.low %v2548_v10, %v2610_v41  ;;  %v1662_v55 = vcombine.low %v2612_v53, %v2619_v62 }
  0x3c   : > { %v1663_v12 = vcombine.low %v2622_v19, %v1506_v29  ;;  %v1670_v16 = vrot.slane %v2177_v42, %v2362_v8  ;;  %v422_v50 = vcombine.high %v2458_v60, %v2458_v60  ;;  %v423_v15 = vcombine.high %v2470_v3, %v2470_v3 }
  0x3d   : > { %v1448_v22 = vcombine.low %v1440_v45, %v1447_v63  ;;  %v1227_v28 = vrot.slane %v1213_v17, %v2362_v8  ;;  %v1677_v2 = vrot.slane %v1661_v33, %v2362_v8  ;;  %v1684_v18 = vrot.slane %v1662_v55, %v2362_v8 }
  0x3e   : > { %v1691_v38 = vrot.slane %v1663_v12, %v2362_v8  ;;  %v600_v57 = vunpack.i.h.s16 %v2470_v3  ;;  %v602_v29 = vunpack.i.h.s16 %v422_v50  ;;  %v604_v42 = vunpack.i.h.s16 %v423_v15 }
  0x3f   : > { %1494 = vrot.lane.b32.xlu1 %v1448_v22, %s2310_s28  ;;  %v1228_v31 = vcombine.low %v1220_v36, %v1227_v28  ;;  %v1692_v5 = vcombine.low %v1670_v16, %v1677_v2  ;;  %v638_v14 = vunpack.i.h.s16 %v2466_v0  ;;  %v2651_v63 = vpack.i.b16 %v2470_v3, %v598_v44  ;;  %v2102_v22 = vld.sshfl [vmem:[%s2360_s22] sm:$0x33 pattern:$0x75316420] }
  0x40   : > { %v1693_v45 = vcombine.low %v1684_v18, %v1691_v38  ;;  %v2653_v17 = vpack.i.b16 %v422_v50, %v600_v57  ;;  %v2655_v54 = vpack.i.b16 %v423_v15, %v602_v29  ;;  %v2658_v33 = vpack.i.b16 %v2466_v0, %v604_v42  ;;  %v2103_v57 = vld.sshfl [vmem:[%s2360_s22 + $0x4] sm:$0x1 pattern:$0x75316420] }
  0x41   : > { %1298 = vrot.lane.b32.xlu0 %v1228_v31, %s2309_s27  ;;  %v1700_v36 = vrot.slane %v1692_v5, %v2362_v8  ;;  %v3002_v55 = vunpack.i.h.s16 %v2473_v4  ;;  %v1611_v3 = vcombine.low %v2455_v58, %v2450_v56  ;;  %v2668_v44 = vcombine.high %v2569_v47, %v2569_v47 }
  0x42   : > { %v1707_v16 = vrot.slane %v1693_v45, %v2362_v8  ;;  %v1612_v0 = vcombine.low %v2651_v63, %v2653_v17  ;;  %v1613_v31 = vcombine.low %v2655_v54, %v2658_v33  ;;  %v2677_v5 = vcombine.high %v2572_v49, %v2572_v49 }
  0x43   : > { %v1504_v12 = vpack.i.b16 %v3002_v55, %v638_v14  ;;  %v1621_v58 = vrot.slane %v1611_v3, %v2362_v8  ;;  %v627_v50 = vunpack.i.h.s16 %v2572_v49  ;;  %v629_v15 = vunpack.i.h.s16 %v2668_v44 }
  0x44   : > { %v1708_v28 = vcombine.low %v1700_v36, %v1707_v16  ;;  %v1628_v2 = vrot.slane %v1612_v0, %v2362_v8  ;;  %v1635_v18 = vrot.slane %v1613_v31, %v2362_v8  ;;  %v631_v38 = vunpack.i.h.s16 %v2677_v5 }
  0x45   : > { %v1614_v14 = vcombine.low %v1504_v12, %v2480_v7  ;;  %v3003_v42 = vunpack.i.h.s16 %v2569_v47  ;;  %v2162_v55 = vpack.i.b16 %v2668_v44, %v627_v50  ;;  %v2163_v12 = vpack.i.b16 %v2677_v5, %v629_v15 }
  0x46   : > { %1778 = vrot.lane.b32.xlu1 %v1708_v28, %s2311_s7  ;;  %v1643_v36 = vcombine.low %v1621_v58, %v1628_v2  ;;  %v2164_v3 = vpack.i.b16 %v2369_v11, %v631_v38  ;;  %v1230_v16 = vcombine.low %v2576_v59, %v2558_v25  ;;  %v217_v0 = vcombine.high %v2102_v22, %v2102_v22 }
  0x47   : > { %v1642_v29 = vrot.slane %v1614_v14, %v2362_v8  ;;  %v2161_v45 = vpack.i.b16 %v2572_v49, %v3003_v42  ;;  %v2699_v35 = vrot.slane %v2102_v22, %v2362_v8  ;;  %v2702_v50 = vrot.slane %v2103_v57, %v2362_v8 }
  0x48   : > { %v1651_v15 = vrot.slane %v1643_v36, %v2362_v8  ;;  %v1232_v42 = vcombine.low %v2163_v12, %v2164_v3  ;;  %v1246_v58 = vrot.slane %v1230_v16, %v2362_v8  ;;  %v2707_v28 = vrot.slane %v217_v0, %v2362_v8  ;;  %v2107_v16 = vld.sshfl [vmem:[%s2360_s22 + $0x14] sm:$0x1 pattern:$0x75316420] }
  0x49   : > { %v1644_v31 = vcombine.low %v1635_v18, %v1642_v29  ;;  %v1231_v14 = vcombine.low %v2161_v45, %v2162_v55  ;;  %3004 = vst [vmem:[#allocation6_spill] sm:$0xff] %v2699_v35  ;;  %3005 = vst [vmem:[#allocation7_spill] sm:$0xff] %v2702_v50  ;;  %v232_v22 = vcombine.high %v2699_v35, %v2699_v35  ;;  %v553_v2 = vunpack.i.h.s16 %v2699_v35  ;;  %v2120_v45 = vld.sshfl [vmem:[%s2360_s22 + $0x48] sm:$0x33 pattern:$0x75316420] }
  0x4a   : > { %3006 = vst [vmem:[#allocation8_spill] sm:$0xff] %v2707_v28  ;;  %v1260_v18 = vrot.slane %v1232_v42, %v2362_v8  ;;  %v1261_v38 = vcombine.low %v2593_v37, %v1246_v58  ;;  %v233_v57 = vcombine.high %v2707_v28, %v2707_v28  ;;  %v555_v29 = vunpack.i.h.s16 %v2707_v28 }
  0x4b   : > { %v1658_v25 = vrot.slane %v1644_v31, %v2362_v8  ;;  %v1253_v59 = vrot.slane %v1231_v14, %v2362_v8  ;;  %v557_v12 = vunpack.i.h.s16 %v232_v22  ;;  %v633_v36 = vunpack.i.h.s16 %v2702_v50 }
  0x4c   : > { %v2145_v3 = vpack.i.b16 %v2707_v28, %v553_v2  ;;  %v1269_v31 = vrot.slane %v1261_v38, %v2362_v8  ;;  %v559_v14 = vunpack.i.h.s16 %v233_v57  ;;  %v2146_v42 = vpack.i.b16 %v232_v22, %v555_v29 }
  0x4d   : > { %v1659_v55 = vcombine.low %v1651_v15, %v1658_v25  ;;  %v1262_v0 = vcombine.low %v1253_v59, %v1260_v18  ;;  %v2147_v37 = vpack.i.b16 %v233_v57, %v557_v12  ;;  %v3007_v58 = vunpack.i.h.s16 %v2381_v20 }
  0x4e   : > { %v651_v47 = vcombine.high %v2120_v45, %v2120_v45  ;;  %v658_v15 = vrot.slane %v2120_v45, %v2362_v8  ;;  %v2148_v62 = vpack.i.b16 %v2702_v50, %v559_v14  ;;  %v1033_v2 = vcombine.low %v2145_v3, %v2146_v42 }
  0x4f   : > { %1776 = vrot.lane.b32.xlu0 %v1659_v55, %s2311_s7  ;;  %v996_v35 = vpack.i.b16 %v3007_v58, %v633_v36  ;;  %v1276_v25 = vrot.slane %v1262_v0, %v2362_v8  ;;  %v2731_v59 = vrot.slane %v2107_v16, %v2362_v8  ;;  %v2737_v38 = vrot.slane %v2461_v61, %v2362_v8 }
  0x50   : > { %v665_v22 = vrot.slane %v651_v47, %v2362_v8  ;;  %v577_v57 = vunpack.i.h.s16 %v2424_v43  ;;  %v1034_v45 = vcombine.low %v2147_v37, %v2148_v62  ;;  %v1043_v55 = vrot.slane %v1033_v2, %v2362_v8 }
  0x51   : > { %v1035_v18 = vcombine.low %v996_v35, %v2389_v24  ;;  %v1277_v29 = vcombine.low %v1269_v31, %v1276_v25  ;;  %v635_v12 = vunpack.i.h.s16 %v2731_v59  ;;  %v2745_v35 = vcombine.high %v2737_v38, %v2737_v38 }
  0x52   : > { %v1449_v3 = vcombine.low %v658_v15, %v665_v22  ;;  %v2171_v16 = vcombine.high %v658_v15, %v665_v22  ;;  %v1050_v61 = vrot.slane %v1034_v45, %v2362_v8  ;;  %v2996_v47 = vunpack.i.h.s16 %v2737_v38 }
  0x53   : > { %v1057_v36 = vrot.slane %v1035_v18, %v2362_v8  ;;  %1300 = vrot.lane.b32.xlu1 %v1277_v29, %s2309_s27  ;;  %v2152_v62 = vpack.i.b16 %v2731_v59, %v577_v57  ;;  %v1082_v0 = vcombine.low %v2384_v21, %v2431_v46  ;;  %v1085_v37 = vcombine.low %v2500_v27, %v2745_v35 }
  0x54   : > { %v1457_v14 = vrot.slane %v1449_v3, %v2362_v8  ;;  %v1464_v42 = vrot.slane %v2171_v16, %v2362_v8  ;;  %v1065_v58 = vcombine.low %v1043_v55, %v1050_v61  ;;  %v1005_v2 = vpack.i.b16 %v2996_v47, %v635_v12 }
  0x55   : > { %v1066_v31 = vcombine.low %v1057_v36, %v2435_v48  ;;  %v1092_v18 = vrot.slane %v1082_v0, %v2362_v8  ;;  %v666_v29 = vcombine.high %v658_v15, %v658_v15  ;;  %v1113_v46 = vrot.slane %v1085_v37, %v2362_v8 }
  0x56   : > { %v1465_v45 = vcombine.low %v1457_v14, %v1464_v42  ;;  %v667_v48 = vcombine.high %v665_v22, %v665_v22  ;;  %v1073_v36 = vrot.slane %v1065_v58, %v2362_v8  ;;  %v1084_v3 = vcombine.low %v2152_v62, %v1005_v2 }
  0x57   : > { %v1080_v57 = vrot.slane %v1066_v31, %v2362_v8  ;;  %v1114_v16 = vcombine.low %v1092_v18, %v2477_v6  ;;  %v683_v43 = vunpack.i.h.s16 %v658_v15  ;;  %v685_v61 = vunpack.i.h.s16 %v665_v22 }
  0x58   : > { %v1472_v55 = vrot.slane %v1465_v45, %v2362_v8  ;;  %v687_v28 = vunpack.i.h.s16 %v666_v29  ;;  %v689_v12 = vunpack.i.h.s16 %v667_v48  ;;  %v1106_v0 = vrot.slane %v1084_v3, %v2362_v8 }
  0x59   : > { %v1081_v47 = vcombine.low %v1073_v36, %v1080_v57  ;;  %v1122_v31 = vrot.slane %v1114_v16, %v2362_v8  ;;  %v2172_v14 = vpack.i.b16 %v665_v22, %v683_v43  ;;  %v2173_v37 = vpack.i.b16 %v666_v29, %v685_v61 }
  0x5a   : > { %v1473_v42 = vcombine.low %v1276_v25, %v1472_v55  ;;  %v2174_v50 = vpack.i.b16 %v667_v48, %v687_v28  ;;  %v2175_v58 = vpack.i.b16 %v2373_v13, %v689_v12  ;;  %v1115_v6 = vcombine.low %v1106_v0, %v1113_v46 }
  0x5b   : > { %1292 = vrot.lane.b32.xlu0 %v1081_v47, %s2309_s27  ;;  %v1709_v15 = vcombine.low %v2572_v49, %v2668_v44  ;;  %v1710_v2 = vcombine.low %v2677_v5, %v2369_v11  ;;  %v2168_v18 = vpack.i.b16 %v2397_v30, %v2511_v32  ;;  %v1711_v43 = vcombine.low %v2172_v14, %v2173_v37 }
  0x5c   : > { %1496 = vrot.lane.b32.xlu1 %v1473_v42, %s2310_s28  ;;  %v1712_v25 = vcombine.low %v2174_v50, %v2175_v58  ;;  %v1350_v28 = vcombine.low %v2152_v62, %v2737_v38  ;;  %v3008_v22 = vunpack.i.h.s16 %v2373_v13  ;;  %v1129_v29 = vrot.slane %v1115_v6, %v2362_v8 }
  0x5d   : > { %v1719_v44 = vrot.slane %v1709_v15, %v2362_v8  ;;  %v1726_v57 = vrot.slane %v1710_v2, %v2362_v8  ;;  %v1351_v5 = vcombine.low %v2518_v40, %v2168_v18  ;;  %v1733_v45 = vrot.slane %v1711_v43, %v2362_v8 }
  0x5e   : > { %v1764_v47 = vrot.slane %v3008_v22, %v2362_v8  ;;  %v1740_v48 = vrot.slane %v1712_v25, %v2362_v8  ;;  %v1358_v50 = vrot.slane %v1350_v28, %v2362_v8  ;;  %v1130_v36 = vcombine.low %v1122_v31, %v1129_v29 }
  0x5f   : > { %v1741_v3 = vcombine.low %v1719_v44, %v1726_v57  ;;  %v1365_v13 = vrot.slane %v1351_v5, %v2362_v8  ;;  %v270_v16 = vcombine.high %v2381_v20, %v2381_v20  ;;  %v271_v12 = vcombine.high %v2389_v24, %v2389_v24 }
  0x60   : > { %v1771_v62 = vrot.slane %v1764_v47, %v2362_v8  ;;  %v1742_v55 = vcombine.low %v1733_v45, %v1740_v48  ;;  %v1366_v61 = vcombine.low %v1358_v50, %v1113_v46  ;;  %v564_v0 = vunpack.i.h.s16 %v2389_v24  ;;  %1294 = vrot.lane.b32.xlu0 %v1130_v36, %s2309_s27 }
  0x61   : > { %v1749_v14 = vrot.slane %v1741_v3, %v2362_v8  ;;  %v1367_v42 = vcombine.low %v1365_v13, %v2562_v39  ;;  %v566_v31 = vunpack.i.h.s16 %v270_v16  ;;  %v634_v37 = vunpack.i.h.s16 %v2384_v21 }
  0x62   : > { %v1756_v58 = vrot.slane %v1742_v55, %v2362_v8  ;;  %v1374_v6 = vrot.slane %v1366_v61, %v2362_v8  ;;  %v568_v15 = vunpack.i.h.s16 %v271_v12  ;;  %v3009_v46 = vunpack.i.h.s16 %v2381_v20 }
  0x63   : > { %v1381_v18 = vrot.slane %v1367_v42, %v2362_v8  ;;  %v2807_v43 = vpack.i.b16 %v270_v16, %v564_v0  ;;  %v2809_v25 = vpack.i.b16 %v271_v12, %v566_v31  ;;  %v3010_v39 = vunpack.i.h.s16 %v2392_v26 }
  0x64   : > { %v2804_v2 = vpack.i.b16 %v2389_v24, %v3009_v46  ;;  %v1757_v22 = vcombine.low %v1749_v14, %v1756_v58  ;;  %v2814_v47 = vpack.i.b16 %v2384_v21, %v568_v15  ;;  %v2176_v29 = vcombine.high %v2392_v26, %v2405_v34 }
  0x65   : > { %v1500_v28 = vpack.i.b16 %v3010_v39, %v634_v37  ;;  %v582_v44 = vunpack.i.h.s16 %v2500_v27  ;;  %v1382_v24 = vcombine.low %v1374_v6, %v1381_v18  ;;  %v584_v45 = vunpack.i.h.s16 %v2745_v35 }
  0x66   : > { %v1513_v57 = vcombine.low %v2804_v2, %v2807_v43  ;;  %1780 = vrot.lane.b32.xlu1 %v1757_v22, %s2311_s7  ;;  %v1514_v48 = vcombine.low %v2809_v25, %v2814_v47  ;;  %v1544_v21 = vrot.slane %v2176_v29, %v2362_v8  ;;  %v586_v50 = vunpack.i.h.s16 %v2518_v40 }
  0x67   : > { %v1515_v5 = vcombine.low %v1500_v28, %v2405_v34  ;;  %v636_v36 = vunpack.i.h.s16 %v2511_v32  ;;  %1490 = vrot.lane.b32.xlu0 %v1382_v24, %s2310_s28  ;;  %v3011_v16 = vunpack.i.h.s16 %v2737_v38  ;;  %v2838_v61 = vpack.i.b16 %v2745_v35, %v582_v44 }
  0x68   : > { %v1523_v3 = vrot.slane %v1513_v57, %v2362_v8  ;;  %v1530_v12 = vrot.slane %v1514_v48, %v2362_v8  ;;  %v2130_v0 = vpack.i.b16 %v2518_v40, %v584_v45  ;;  %v2131_v14 = vpack.i.b16 %v2511_v32, %v586_v50 }
  0x69   : > { %v1537_v13 = vrot.slane %v1515_v5, %v2362_v8  ;;  %v2835_v55 = vpack.i.b16 %v2500_v27, %v3011_v16  ;;  %v3012_v42 = vunpack.i.h.s16 %v2397_v30  ;;  %v1565_v27 = vcombine.low %v2440_v51, %v2444_v52 }
  0x6a   : > { %1782 = vrot.lane.b32.xlu1 %v1771_v62, %s2311_s7  ;;  %v1545_v35 = vcombine.low %v1523_v3, %v1530_v12  ;;  %v1563_v6 = vcombine.low %v2838_v61, %v2130_v0  ;;  %v2132_v40 = vpack.i.b16 %v2458_v60, %v2450_v56  ;;  %v831_v62 = vcombine.low %v2130_v0, %v2131_v14 }
  0x6b   : > { %v1502_v31 = vpack.i.b16 %v3012_v42, %v636_v36  ;;  %v1546_v37 = vcombine.low %v1537_v13, %v1544_v21  ;;  %v1562_v58 = vcombine.low %v2731_v59, %v2835_v55  ;;  %v1593_v18 = vrot.slane %v1565_v27, %v2362_v8 }
  0x6c   : > { %v1553_v39 = vrot.slane %v1545_v35, %v2362_v8  ;;  %v1579_v28 = vrot.slane %v1563_v6, %v2362_v8  ;;  %v832_v22 = vcombine.low %v2397_v30, %v2440_v51  ;;  %v2143_v29 = vcombine.high %v2397_v30, %v2440_v51  ;;  %v3015_v6 = vld [vmem:[#allocation7_spill] sm:$0xff] }
  0x6d   : > { %v1564_v15 = vcombine.low %v2131_v14, %v1502_v31  ;;  %v1560_v32 = vrot.slane %v1546_v37, %v2362_v8  ;;  %v1572_v46 = vrot.slane %v1562_v58, %v2362_v8  ;;  %v834_v56 = vcombine.low %v2132_v40, %v2651_v63  ;;  %v3014_v14 = vld [vmem:[#allocation4_spill] sm:$0xff] }
  0x6e   : > { %v2137_v60 = vpack.i.b16 %v2555_v23, %v2548_v10  ;;  %v841_v5 = vrot.slane %v831_v62, %v2362_v8  ;;  %v848_v45 = vrot.slane %v832_v22, %v2362_v8  ;;  %v855_v48 = vrot.slane %v2143_v29, %v2362_v8 }
  0x6f   : > { %v1586_v52 = vrot.slane %v1564_v15, %v2362_v8  ;;  %v1561_v44 = vcombine.low %v1553_v39, %v1560_v32  ;;  %v1594_v24 = vcombine.low %v1572_v46, %v1579_v28  ;;  %v862_v21 = vrot.slane %v834_v56, %v2362_v8  ;;  %v3016_v46 = vld [vmem:[#allocation8_spill] sm:$0xff] }
  0x70   : > { %v880_v50 = vcombine.low %v2653_v17, %v2655_v54  ;;  %v881_v10 = vcombine.low %v2658_v33, %v2473_v4  ;;  %v882_v23 = vcombine.low %v2480_v7, %v2539_v1  ;;  %v863_v63 = vcombine.low %v841_v5, %v848_v45  ;;  %v3013_v1 = vld [vmem:[#allocation5_spill] sm:$0xff] }
  0x71   : > { %v1595_v57 = vcombine.low %v1586_v52, %v1593_v18  ;;  %1772 = vrot.lane.b32.xlu0 %v1561_v44, %s2311_s7  ;;  %v1602_v30 = vrot.slane %v1594_v24, %v2362_v8  ;;  %v864_v36 = vcombine.low %v855_v48, %v862_v21  ;;  %v883_v3 = vcombine.low %v2545_v9, %v2137_v60 }
  0x72   : > { %v890_v13 = vrot.slane %v880_v50, %v2362_v8  ;;  %v897_v17 = vrot.slane %v881_v10, %v2362_v8  ;;  %v904_v54 = vrot.slane %v882_v23, %v2362_v8  ;;  %v929_v12 = vcombine.low %v2610_v41, %v2612_v53 }
  0x73   : > { %v1609_v51 = vrot.slane %v1595_v57, %v2362_v8  ;;  %v871_v0 = vrot.slane %v863_v63, %v2362_v8  ;;  %v878_v4 = vrot.slane %v864_v36, %v2362_v8  ;;  %v911_v7 = vrot.slane %v883_v3, %v2362_v8 }
  0x74   : > { %v930_v33 = vcombine.low %v3013_v1, %v2622_v19  ;;  %v912_v9 = vcombine.low %v890_v13, %v897_v17  ;;  %v931_v42 = vcombine.low %v3014_v14, %v2572_v49  ;;  %v2144_v31 = vcombine.high %v3014_v14, %v2572_v49  ;;  %v3017_v49 = vld [vmem:[#allocation6_spill] sm:$0xff] }
  0x75   : > { %v1610_v16 = vcombine.low %v1602_v30, %v1609_v51  ;;  %v939_v41 = vrot.slane %v929_v12, %v2362_v8  ;;  %v879_v53 = vcombine.low %v871_v0, %v878_v4  ;;  %v913_v37 = vcombine.low %v904_v54, %v911_v7 }
  0x76   : > { %v946_v58 = vrot.slane %v930_v33, %v2362_v8  ;;  %v920_v27 = vrot.slane %v912_v9, %v2362_v8  ;;  %v953_v35 = vrot.slane %v931_v42, %v2362_v8  ;;  %v960_v19 = vrot.slane %v2144_v31, %v2362_v8 }
  0x77   : > { %1774 = vrot.lane.b32.xlu0 %v1610_v16, %s2311_s7  ;;  %v2122_v15 = vpack.i.b16 %v2381_v20, %v3015_v6  ;;  %v927_v40 = vrot.slane %v913_v37, %v2362_v8  ;;  %v733_v18 = vcombine.low %v3017_v49, %v3016_v46  ;;  %v2142_v39 = vcombine.high %v3017_v49, %v3016_v46 }
  0x78   : > { %v961_v32 = vcombine.low %v939_v41, %v946_v58  ;;  %v962_v28 = vcombine.low %v953_v35, %v960_v19  ;;  %v736_v62 = vcombine.low %v2807_v43, %v2809_v25  ;;  %v2127_v22 = vpack.i.b16 %v2737_v38, %v2731_v59  ;;  %v3018_v25 = vld [vmem:[#allocation2_spill] sm:$0xff]  ;;  %v3019_v38 = vld [vmem:[#allocation3_spill] sm:$0xff] }
  0x79   : > { %v735_v52 = vcombine.low %v2122_v15, %v2804_v2  ;;  %v928_v29 = vcombine.low %v920_v27, %v927_v40  ;;  %v743_v56 = vrot.slane %v733_v18, %v2362_v8  ;;  %v750_v60 = vrot.slane %v2142_v39, %v2362_v8 }
  0x7a   : > { %v969_v20 = vrot.slane %v961_v32, %v2362_v8  ;;  %v976_v44 = vrot.slane %v962_v28, %v2362_v8  ;;  %v764_v57 = vrot.slane %v736_v62, %v2362_v8  ;;  %v782_v2 = vcombine.low %v2814_v47, %v2392_v26 }
  0x7b   : > { %v757_v24 = vrot.slane %v735_v52, %v2362_v8  ;;  %v765_v43 = vcombine.low %v743_v56, %v750_v60  ;;  %v783_v59 = vcombine.low %v2405_v34, %v3018_v25  ;;  %v784_v5 = vcombine.low %v3019_v38, %v2127_v22 }
  0x7c   : > { %v785_v45 = vcombine.low %v2835_v55, %v2838_v61  ;;  %v977_v48 = vcombine.low %v969_v20, %v976_v44  ;;  %v792_v50 = vrot.slane %v782_v2, %v2362_v8  ;;  %v632_v37 = vunpack.i.l.s16 %v2369_v11 }
  0x7d   : > { %v766_v21 = vcombine.low %v757_v24, %v764_v57  ;;  %v773_v30 = vrot.slane %v765_v43, %v2362_v8  ;;  %v799_v51 = vrot.slane %v783_v59, %v2362_v8  ;;  %v806_v10 = vrot.slane %v784_v5, %v2362_v8 }
  0x7e   : > { %v813_v26 = vrot.slane %v785_v45, %v2362_v8 }
  0x7f   : > { %v780_v47 = vrot.slane %v766_v21, %v2362_v8  ;;  %v814_v34 = vcombine.low %v792_v50, %v799_v51 }
  0x80   : > { %v815_v23 = vcombine.low %v806_v10, %v813_v26 }
  0x81   : > { %v781_v63 = vcombine.low %v773_v30, %v780_v47  ;;  %v822_v36 = vrot.slane %v814_v34, %v2362_v8 }
  0x82   : > { %v829_v55 = vrot.slane %v815_v23, %v2362_v8 }
  0x84   : > { %v830_v61 = vcombine.low %v822_v36, %v829_v55 }
  0x8f   : > { %v1303_v3 = vpop.permute.xlu1 %1302 }
  0x93   : > { %v1499_v13 = vpop.permute.xlu1 %1498 }
  0x9d   : > { %v1489_v16 = vpop.permute.xlu0 %1488 }
  0xa4   : > { %v1493_v17 = vpop.permute.xlu1 %1492 }
  0xa8   : > { %v1297_v54 = vpop.permute.xlu0 %1296 }
  0xa9   : > { %v1793_v7 = vsel %vm1784_vm0, %v879_v53, %v1297_v54  ;;  %v984_v53 = vrot.slane %v632_v37, %v2362_v8 }
  0xaa   : > { %v1809_v14 = vsel %vm1803_vm1, %v1793_v7, %v1493_v17 }
  0xab   : > { %v991_v19 = vrot.slane %v984_v53, %v2362_v8 }
  0xad   : > { %v1802_v32 = vsel %vm1784_vm0, %v991_v19, %v1303_v3 }
  0xae   : > { %v1815_v11 = vsel %vm1803_vm1, %v1802_v32, %v1499_v13 }
  0xb1   : > { %v1495_v12 = vpop.permute.xlu1 %1494 }
  0xb3   : > { %v1299_v0 = vpop.permute.xlu0 %1298 }
  0xb4   : > { %v1796_v4 = vsel %vm1784_vm0, %v928_v29, %v1299_v0 }
  0xb5   : > { %v1811_v33 = vsel %vm1803_vm1, %v1796_v4, %v1495_v12 }
  0xb8   : > { %v1779_v1 = vpop.permute.xlu1 %1778 }
  0xb9   : > { %v1827_v31 = vsel %vm1816_vm2, %v1811_v33, %v1779_v1 }
  0xc1   : > { %v1777_v9 = vpop.permute.xlu0 %1776 }
  0xc2   : > { %v1824_v42 = vsel %vm1816_vm2, %v1809_v14, %v1777_v9 }
  0xc3   : > { %2222 = vmatprep.mubr.bf16.mxu1 %v1824_v42 }
  0xc4   : > { %2223 = vmatmul.mubr.bf16.vlgmr.msra.gmra.mrb[0].mxu1 %v1827_v31 }
  0xc5   : > { %v1301_v41 = vpop.permute.xlu1 %1300 }
  0xc6   : > { %v1799_v35 = vsel %vm1784_vm0, %v977_v48, %v1301_v41 }
  0xcd   : > { %v1293_v58 = vpop.permute.xlu0 %1292 }
  0xce   : > { %v1497_v27 = vpop.permute.xlu1 %1496  ;;  %v1787_v28 = vsel %vm1784_vm0, %v781_v63, %v1293_v58 }
  0xcf   : > { %v1813_v6 = vsel %vm1803_vm1, %v1799_v35, %v1497_v27  ;;  %v1805_v52 = vsel %vm1803_vm1, %v1787_v28, %v1489_v16 }
  0xd2   : > { %v1295_v15 = vpop.permute.xlu0 %1294 }
  0xd3   : > { %v1790_v22 = vsel %vm1784_vm0, %v830_v61, %v1295_v15 }
  0xd8   : > { %v1781_v40 = vpop.permute.xlu1 %1780 }
  0xd9   : > { %v1830_v46 = vsel %vm1816_vm2, %v1813_v6, %v1781_v40  ;;  %v1491_v49 = vpop.permute.xlu0 %1490 }
  0xda   : > { %2226 = vmatprep.mubr.bf16.mxu1 %v1830_v46  ;;  %v1807_v29 = vsel %vm1803_vm1, %v1790_v22, %v1491_v49 }
  0xdc   : > { %v1783_v18 = vpop.permute.xlu1 %1782 }
  0xdd   : > { %v1833_v39 = vsel %vm1816_vm2, %v1815_v11, %v1783_v18 }
  0xde   : > { %2227 = vmatmul.mubr.bf16.gmra.mrb[4].mxu1 %v1833_v39 }
  0xe3   : > { %v1773_v8 = vpop.permute.xlu0 %1772 }
  0xe4   : > { %v1818_v62 = vsel %vm1816_vm2, %v1805_v52, %v1773_v8 }
  0xe5   : > { %2218 = vmatprep.mubr.bf16.mxu0 %v1818_v62 }
  0xe9   : > { %v1775_v20 = vpop.permute.xlu0 %1774 }
  0xea   : > { %v1821_v56 = vsel %vm1816_vm2, %v1807_v29, %v1775_v20 }
  0xeb   : > { %2219 = vmatmul.mubr.bf16.vlgmr.msra.gmra.mrb[0].mxu0 %v1821_v56 }
 0x197   : > { %v2224_v60 = vpop.f32.mrb[0].mxu1 }
 0x198   : > { %v1985_v44 = vmul.f32 0.2, %v2224_v60  ;;  %v1949_v24 = vpop.f32.mrb[1].mxu1 }
 0x199   : > { %v1983_v57 = vmul.f32 0.2, %v1949_v24  ;;  %v2225_v2 = vpop.f32.mrb[2].mxu1 }
 0x19a   : > { %v1996_v43 = vmax.f32 %v2224_v60, %v1985_v44  ;;  %v1986_v25 = vmul.f32 0.2, %v2225_v2  ;;  %v1952_v59 = vpop.f32.mrb[3].mxu1 }
 0x19b   : > { %v1994_v38 = vmax.f32 %v1949_v24, %v1983_v57  ;;  %v1984_v5 = vmul.f32 0.2, %v1952_v59 }
 0x19c   : > { %2007 = vst [vmem:[%s2958_s15 + $0x30] sm:$0xff] %v1996_v43  ;;  %v1997_v45 = vmax.f32 %v2225_v2, %v1986_v25 }
 0x19d   : > { %2005 = vst [vmem:[%s2958_s15 + $0x20] sm:$0xff] %v1994_v38  ;;  %v1995_v48 = vmax.f32 %v1952_v59, %v1984_v5 }
 0x19e   : > { %2008 = vst [vmem:[%s2958_s15 + $0x38] sm:$0xff] %v1997_v45 }
 0x19f   : > { %2006 = vst [vmem:[%s2958_s15 + $0x28] sm:$0xff] %v1995_v48 }
 0x1b1   : > { %v2228_v21 = vpop.f32.mrb[4].mxu1 }
 0x1b2   : > { %v1989_v50 = vmul.f32 0.2, %v2228_v21  ;;  %v1965_v30 = vpop.f32.mrb[5].mxu1 }
 0x1b3   : > { %v1987_v51 = vmul.f32 0.2, %v1965_v30  ;;  %v2229_v10 = vpop.f32.mrb[6].mxu1 }
 0x1b4   : > { %v2000_v26 = vmax.f32 %v2228_v21, %v1989_v50  ;;  %v1968_v47 = vpop.f32.mrb[7].mxu1 }
 0x1b5   : > { %v1998_v34 = vmax.f32 %v1965_v30, %v1987_v51  ;;  %v1988_v23 = vmul.f32 0.2, %v1968_v47 }
 0x1b6   : > { %2011 = vst [vmem:[%s2958_s15 + $0x50] sm:$0x1] %v2000_v26 }
 0x1b7   : > { %2009 = vst [vmem:[%s2958_s15 + $0x40] sm:$0xff] %v1998_v34  ;;  %v1999_v63 = vmax.f32 %v1968_v47, %v1988_v23 }
 0x1b9   : > { %2010 = vst [vmem:[%s2958_s15 + $0x48] sm:$0xff] %v1999_v63 }
 0x1be   : > { %v2220_v36 = vpop.f32.mrb[0].mxu0 }
 0x1bf   : > { %v1981_v55 = vmul.f32 0.2, %v2220_v36  ;;  %v1933_v61 = vpop.f32.mrb[1].mxu0 }
 0x1c0   : > { %v1979_v3 = vmul.f32 0.2, %v1933_v61  ;;  %v2221_v13 = vpop.f32.mrb[2].mxu0 }
 0x1c1   : > { %v1992_v16 = vmax.f32 %v2220_v36, %v1981_v55  ;;  %v1982_v17 = vmul.f32 0.2, %v2221_v13  ;;  %v1936_v54 = vpop.f32.mrb[3].mxu0 }
 0x1c2   : > { %v1990_v12 = vmax.f32 %v1933_v61, %v1979_v3  ;;  %v1980_v0 = vmul.f32 0.2, %v1936_v54 }
 0x1c3   : > { %2003 = vst [vmem:[%s2958_s15 + $0x10] sm:$0xff] %v1992_v16  ;;  %v1993_v4 = vmax.f32 %v2221_v13, %v1982_v17 }
 0x1c4   : > { %2001 = vst [vmem:[%s2958_s15] sm:$0xff] %v1990_v12  ;;  %v1991_v7 = vmax.f32 %v1936_v54, %v1980_v0 }
 0x1c5   : > { %2004 = vst [vmem:[%s2958_s15 + $0x18] sm:$0xff] %v1993_v4 }
 0x1c6   : > { %2002 = vst [vmem:[%s2958_s15 + $0x8] sm:$0xff] %v1991_v7 }
 0x1c7 PF: > { %s12_s11 = sadd.s32 1, %s2306_s11   ;;  %s3020_s9 = smov %s2302_s10 }
 0x1c8   : > { %p9_p5 = scmp.ge.s32.totalorder %s12_s11, 4   ;;  %s3021_s10 = smov %s3023_s12 }
 0x1ca   :  { %11 = sbr.rel (!%p9_p5) target bundleno = 2 (0x2), region = 59 }

</bundles_post_ra>
